<compile_context>
chip_gen: v7x
topology: tpu7x:2x2x1
jax: 0.10.0
libtpu: 0.0.40
codegen_flags: <defaults>
</compile_context>

<pallas_src>
import functools

import jax
import jax.numpy as jnp
from jax import lax
from jax.experimental import pallas as pl
from jax.experimental.pallas import tpu as pltpu

LANES = 128
ACC_SUB = 8                    # f32 accumulator sublanes
CHUNK = 128                    # rows per inner-loop step (multiple of 32: ok for f32/bf16/int8)
TARGET_BLOCK_BYTES = 4 * 1024 * 1024   # combined input bytes streamed per grid step


def _min_sublanes(dtype):
    # Native packed-tile rows: f32 -> 8, bf16/f16 -> 16, int8/fp8 -> 32.
    return max(8, 32 // jnp.dtype(dtype).itemsize)


def _accum_chunk(inp_ref, tgt_ref, acc_u, acc_u2, acc_d2, shift, row_lo, n_rows,
                 *, row0, full_rows, rem_lanes, masked):
    """Accumulate one (n_rows, 128) chunk into the (8,128) partial sums."""
    t = tgt_ref[pl.ds(row_lo, n_rows), :].astype(jnp.float32)
    x = inp_ref[pl.ds(row_lo, n_rows), :].astype(jnp.float32)
    u = t - shift            # shifted target (stable ss_tot accumulation)
    d = t - x                # residual (the shift cancels)
    if masked:
        gr = row0 + row_lo + lax.broadcasted_iota(jnp.int32, (n_rows, LANES), 0)
        if rem_lanes:
            gl = lax.broadcasted_iota(jnp.int32, (n_rows, LANES), 1)
            valid = (gr < full_rows) | ((gr == full_rows) & (gl < rem_lanes))
        else:
            valid = gr < full_rows
        u = jnp.where(valid, u, 0.0)
        d = jnp.where(valid, d, 0.0)
    k = n_rows // ACC_SUB
    # Fold (n_rows,128) -> (k,8,128) and reduce the leading axis: pure VPU
    # vreg adds (no XLU cross-lane reduce inside the hot loop).
    acc_u[...] += jnp.sum(u.reshape(k, ACC_SUB, LANES), axis=0)
    acc_u2[...] += jnp.sum((u * u).reshape(k, ACC_SUB, LANES), axis=0)
    acc_d2[...] += jnp.sum((d * d).reshape(k, ACC_SUB, LANES), axis=0)


def _r2_partials_kernel(shift_ref, inp_ref, tgt_ref, out_ref,
                        acc_u, acc_u2, acc_d2, *,
                        block_rows, blocks_per_core, full_rows, rem_lanes):
    c = pl.program_id(0)               # "core" (parallel) axis
    j = pl.program_id(1)               # streaming (arbitrary) axis

    @pl.when(j == 0)
    def _init():
        acc_u[...] = jnp.zeros_like(acc_u)
        acc_u2[...] = jnp.zeros_like(acc_u2)
        acc_d2[...] = jnp.zeros_like(acc_d2)

    shift = shift_ref[0, 0]
    blk = c * blocks_per_core + j      # logical (unclamped) block index
    row0 = blk * block_rows            # first global row this block claims

    num_full_chunks = block_rows // CHUNK
    rem_rows = block_rows % CHUNK      # static; multiple of the dtype sublane count

    def process(masked):
        acc = functools.partial(_accum_chunk, inp_ref, tgt_ref, acc_u, acc_u2,
                                acc_d2, shift, row0=row0, full_rows=full_rows,
                                rem_lanes=rem_lanes, masked=masked)
        if num_full_chunks > 0:
            def body(i, carry):
                acc(pl.multiple_of(i * CHUNK, CHUNK), CHUNK)
                return carry
            lax.fori_loop(0, num_full_chunks, body, 0)
        if rem_rows:
            acc(num_full_chunks * CHUNK, rem_rows)

    # Fast path: every element of this block is real data -> no masking cost.
    block_is_full = row0 + block_rows <= full_rows

    @pl.when(block_is_full)
    def _fast():
        process(masked=False)

    @pl.when(jnp.logical_not(block_is_full))
    def _edge():
        process(masked=True)

    @pl.when(j == pl.num_programs(1) - 1)
    def _finalize():
        out_ref[0, 0] = acc_u[...]     # sum(t - shift)
        out_ref[0, 1] = acc_u2[...]    # sum((t - shift)^2)
        out_ref[0, 2] = acc_d2[...]    # sum((t - x)^2)


def r2_score_loss(inp, target, weight=1.0):
    assert inp.shape == target.shape, "input/target shapes must match"
    n = int(inp.size)

    x = jnp.ravel(inp)
    t = jnp.ravel(target)

    sub = max(_min_sublanes(inp.dtype), _min_sublanes(target.dtype))
    tile = sub * LANES

    # Pad (at most one native tile) only when numel isn't tile-aligned; padded
    # elements never contribute thanks to the in-kernel element mask.
    pad = (-n) % tile
    if pad:
        # TODO(synk): this jnp.pad still copies both arrays once in HBM; it is
        # only hit when numel isn't a multiple of sub*128 (rare for NCHW losses).
        x = jnp.pad(x, (0, pad))
        t = jnp.pad(t, (0, pad))

    rows = (n + pad) // LANES                      # multiple of `sub`
    x = x.reshape(rows, LANES)
    t = t.reshape(rows, LANES)

    # Block size: ~TARGET_BLOCK_BYTES of combined input bytes per grid step.
    bytes_per_row = LANES * (jnp.dtype(inp.dtype).itemsize +
                             jnp.dtype(target.dtype).itemsize)
    tm_max = max(CHUNK, (TARGET_BLOCK_BYTES // bytes_per_row) // CHUNK * CHUNK)
    block_rows = min(rows, tm_max)

    nb_total = pl.cdiv(rows, block_rows)
    ncs = 2 if nb_total >= 2 else 1                # 2-way split feeds both v7x TCs
    spc = pl.cdiv(nb_total, ncs)                   # grid steps per core

    full_rows = n // LANES                         # rows that are completely valid
    rem_lanes = n % LANES                          # valid lanes in the partial row

    # Numerical-stability shift for ss_tot: any value near the data works.
    shift = t[0:1, 0:1].astype(jnp.float32)        # (1,1) SMEM scalar

    kernel = functools.partial(
        _r2_partials_kernel,
        block_rows=block_rows, blocks_per_core=spc,
        full_rows=full_rows, rem_lanes=rem_lanes)

    def in_map(c, j):
        # Clamp so a possible "phantom" block (odd nb_total) re-reads the last
        # real block; its logical row range is fully masked inside the kernel.
        return (jnp.minimum(c * spc + j, nb_total - 1), 0)

    parts = pl.pallas_call(
        kernel,
        out_shape=jax.ShapeDtypeStruct((ncs, 3, ACC_SUB, LANES), jnp.float32),
        grid_spec=pltpu.PrefetchScalarGridSpec(
            num_scalar_prefetch=0,
            grid=(ncs, spc),
            in_specs=[
                pl.BlockSpec(memory_space=pltpu.MemorySpace.SMEM),   # shift (1,1)
                pl.BlockSpec((block_rows, LANES), in_map),           # input
                pl.BlockSpec((block_rows, LANES), in_map),           # target
            ],
            out_specs=pl.BlockSpec((1, 3, ACC_SUB, LANES),
                                   lambda c, j: (c, 0, 0, 0)),
            scratch_shapes=[
                pltpu.VMEM((ACC_SUB, LANES), jnp.float32),   # sum(t - shift)
                pltpu.VMEM((ACC_SUB, LANES), jnp.float32),   # sum((t - shift)^2)
                pltpu.VMEM((ACC_SUB, LANES), jnp.float32),   # sum((t - x)^2)
            ],
        ),
        compiler_params=pltpu.CompilerParams(
            dimension_semantics=("parallel", "arbitrary"),
            vmem_limit_bytes=32 * 1024 * 1024,
        ),
    )(shift, x, t)

    # Combine per-core lane-dense partials and do the cheap final math in JAX.
    sums = jnp.sum(parts, axis=(0, 2, 3))          # (3,)
    sum_u, sum_u2, ss_res = sums[0], sums[1], sums[2]
    # ss_tot = sum((t - mean(t))^2) = sum(u^2) - sum(u)^2 / N  with u = t - shift.
    ss_tot = sum_u2 - (sum_u * sum_u) / jnp.float32(n)
    # Constant target (ss_tot == 0) yields inf/nan, matching the PyTorch reference.
    return weight * ss_res / ss_tot


def r2_score_loss_ref(inp, target, weight=1.0):
    t = target.astype(jnp.float32)
    x = inp.astype(jnp.float32)
    ss_tot = jnp.sum((t - jnp.mean(t)) ** 2)
    ss_res = jnp.sum((t - x) ** 2)
    r2 = 1.0 - ss_res / ss_tot
    return weight * (1.0 - r2)


if __name__ == "__main__":
    key = jax.random.PRNGKey(0)
    k1, k2 = jax.random.split(key)

    def check(shape, dtype, weight, rtol, atol=1e-6, mean_offset=0.0):
        tgt = jax.random.normal(k1, shape, dtype=jnp.float32) + mean_offset
        inp = tgt + 0.1 * jax.random.normal(k2, shape, dtype=jnp.float32)
        tgt = tgt.astype(dtype)
        inp = inp.astype(dtype)
        got = jax.block_until_ready(r2_score_loss(inp, tgt, weight=weight))
        want = r2_score_loss_ref(inp, tgt, weight=weight)
        assert jnp.allclose(got, want, rtol=rtol, atol=atol), (shape, dtype, got, want)

    # Primary small example consistent with an NCHW regression output.
    check((2, 4, 16, 16), jnp.float32, 1.0, rtol=1e-5)
    # Unaligned numel: exercises the one-tile pad + row/lane element mask.
    check((3, 7, 61, 33), jnp.float32, 2.0, rtol=1e-4)
    # Multi-block path: odd block count -> 2-way core split + clamped phantom block.
    check((2, 9, 240, 256), jnp.float32, 1.0, rtol=1e-4)
    # bf16 inputs: 16-row packed tiles, doubled rows per block.
    check((4, 4, 32, 32), jnp.bfloat16, 1.0, rtol=1e-3, atol=1e-4)
    # Large-mean data: shifted ss_tot accumulation stays accurate.
    check((2, 4, 16, 16), jnp.float32, 1.0, rtol=1e-4, mean_offset=100.0)

    print("KERNEL_OK")
</pallas_src>

<mosaic_0001>
module attributes {stable_mosaic.version = 11 : i64} {
  func.func @_r2_partials_kernel(%arg0: i32, %arg1: i32, %arg2: memref<1x1xf32, #tpu.memory_space<smem>>, %arg3: memref<16x128xf32, #tpu.memory_space<vmem>>, %arg4: memref<16x128xf32, #tpu.memory_space<vmem>>, %arg5: memref<1x3x8x128xf32, #tpu.memory_space<vmem>>, %arg6: memref<8x128xf32, #tpu.memory_space<vmem>>, %arg7: memref<8x128xf32, #tpu.memory_space<vmem>>, %arg8: memref<8x128xf32, #tpu.memory_space<vmem>>) attributes {dimension_semantics = [#tpu.dimension_semantics<parallel>, #tpu.dimension_semantics<arbitrary>], iteration_bounds = array<i64: 1, 1>, scalar_prefetch = 0 : i64, scratch_operands = 3 : i64, tpu.core_type = #tpu.core_type<tc>, window_params = [{transform_indices = @transform_0, window_bounds = array<i64: 1, 1>}, {transform_indices = @transform_1, window_bounds = array<i64: 16, 128>}, {transform_indices = @transform_2, window_bounds = array<i64: 16, 128>}, {transform_indices = @transform_3, window_bounds = array<i64: 1, 3, 8, 128>}]} {
    %c0_i32 = arith.constant 0 : i32
    %0 = arith.cmpi eq, %arg1, %c0_i32 : i32
    %1 = arith.extui %0 : i1 to i32
    %c0_i32_0 = arith.constant 0 : i32
    %2 = arith.cmpi ne, %1, %c0_i32_0 : i32
    scf.if %2 {
      %cst = arith.constant 0.000000e+00 : f32
      %17 = vector.broadcast %cst : f32 to vector<8x128xf32>
      %c0_8 = arith.constant 0 : index
      %c0_9 = arith.constant 0 : index
      %18 = vector.load %arg6[%c0_8, %c0_9] : memref<8x128xf32, #tpu.memory_space<vmem>>, vector<8x128xf32>
      tpu.vector_store %arg6[%c0_8, %c0_9], %17 {strides = array<i32>} : memref<8x128xf32, #tpu.memory_space<vmem>>, vector<8x128xf32>,
      %cst_10 = arith.constant 0.000000e+00 : f32
      %19 = vector.broadcast %cst_10 : f32 to vector<8x128xf32>
      %c0_11 = arith.constant 0 : index
      %c0_12 = arith.constant 0 : index
      %20 = vector.load %arg7[%c0_11, %c0_12] : memref<8x128xf32, #tpu.memory_space<vmem>>, vector<8x128xf32>
      tpu.vector_store %arg7[%c0_11, %c0_12], %19 {strides = array<i32>} : memref<8x128xf32, #tpu.memory_space<vmem>>, vector<8x128xf32>,
      %cst_13 = arith.constant 0.000000e+00 : f32
      %21 = vector.broadcast %cst_13 : f32 to vector<8x128xf32>
      %c0_14 = arith.constant 0 : index
      %c0_15 = arith.constant 0 : index
      %22 = vector.load %arg8[%c0_14, %c0_15] : memref<8x128xf32, #tpu.memory_space<vmem>>, vector<8x128xf32>
      tpu.vector_store %arg8[%c0_14, %c0_15], %21 {strides = array<i32>} : memref<8x128xf32, #tpu.memory_space<vmem>>, vector<8x128xf32>,
    } else {
    }
    %c0 = arith.constant 0 : index
    %c0_1 = arith.constant 0 : index
    %3 = memref.load %arg2[%c0, %c0_1] : memref<1x1xf32, #tpu.memory_space<smem>>
    %c1_i32 = arith.constant 1 : i32
    %4 = arith.muli %arg0, %c1_i32 : i32
    %5 = arith.addi %4, %arg1 : i32
    %c16_i32 = arith.constant 16 : i32
    %6 = arith.muli %5, %c16_i32 : i32
    %c16_i32_2 = arith.constant 16 : i32
    %7 = arith.addi %6, %c16_i32_2 : i32
    %c16_i32_3 = arith.constant 16 : i32
    %8 = arith.cmpi sle, %7, %c16_i32_3 : i32
    %9 = arith.extui %8 : i1 to i32
    %c0_i32_4 = arith.constant 0 : i32
    %10 = arith.cmpi ne, %9, %c0_i32_4 : i32
    scf.if %10 {
      %c0_8 = arith.constant 0 : index
      %c0_9 = arith.constant 0 : index
      %17 = vector.load %arg4[%c0_8, %c0_9] : memref<16x128xf32, #tpu.memory_space<vmem>>, vector<16x128xf32>
      %c0_10 = arith.constant 0 : index
      %c0_11 = arith.constant 0 : index
      %18 = vector.load %arg3[%c0_10, %c0_11] : memref<16x128xf32, #tpu.memory_space<vmem>>, vector<16x128xf32>
      %19 = vector.broadcast %3 : f32 to vector<16x128xf32>
      %20 = arith.subf %17, %19 : vector<16x128xf32>
      %21 = arith.subf %17, %18 : vector<16x128xf32>
      %c0_12 = arith.constant 0 : index
      %c0_13 = arith.constant 0 : index
      %22 = vector.load %arg6[%c0_12, %c0_13] : memref<8x128xf32, #tpu.memory_space<vmem>>, vector<8x128xf32>
      %23 = vector.shape_cast %20 : vector<16x128xf32> to vector<2x8x128xf32>
      %cst = arith.constant dense<0.000000e+00> : vector<8x128xf32>
      %24 = vector.multi_reduction <add>, %23, %cst [0] : vector<2x8x128xf32> to vector<8x128xf32>
      %25 = arith.addf %22, %24 : vector<8x128xf32>
      %c0_14 = arith.constant 0 : index
      %c0_15 = arith.constant 0 : index
      %26 = vector.load %arg6[%c0_14, %c0_15] : memref<8x128xf32, #tpu.memory_space<vmem>>, vector<8x128xf32>
      tpu.vector_store %arg6[%c0_14, %c0_15], %25 {strides = array<i32>} : memref<8x128xf32, #tpu.memory_space<vmem>>, vector<8x128xf32>,
      %c0_16 = arith.constant 0 : index
      %c0_17 = arith.constant 0 : index
      %27 = vector.load %arg7[%c0_16, %c0_17] : memref<8x128xf32, #tpu.memory_space<vmem>>, vector<8x128xf32>
      %28 = arith.mulf %20, %20 : vector<16x128xf32>
      %29 = vector.shape_cast %28 : vector<16x128xf32> to vector<2x8x128xf32>
      %cst_18 = arith.constant dense<0.000000e+00> : vector<8x128xf32>
      %30 = vector.multi_reduction <add>, %29, %cst_18 [0] : vector<2x8x128xf32> to vector<8x128xf32>
      %31 = arith.addf %27, %30 : vector<8x128xf32>
      %c0_19 = arith.constant 0 : index
      %c0_20 = arith.constant 0 : index
      %32 = vector.load %arg7[%c0_19, %c0_20] : memref<8x128xf32, #tpu.memory_space<vmem>>, vector<8x128xf32>
      tpu.vector_store %arg7[%c0_19, %c0_20], %31 {strides = array<i32>} : memref<8x128xf32, #tpu.memory_space<vmem>>, vector<8x128xf32>,
      %c0_21 = arith.constant 0 : index
      %c0_22 = arith.constant 0 : index
      %33 = vector.load %arg8[%c0_21, %c0_22] : memref<8x128xf32, #tpu.memory_space<vmem>>, vector<8x128xf32>
      %34 = arith.mulf %21, %21 : vector<16x128xf32>
      %35 = vector.shape_cast %34 : vector<16x128xf32> to vector<2x8x128xf32>
      %cst_23 = arith.constant dense<0.000000e+00> : vector<8x128xf32>
      %36 = vector.multi_reduction <add>, %35, %cst_23 [0] : vector<2x8x128xf32> to vector<8x128xf32>
      %37 = arith.addf %33, %36 : vector<8x128xf32>
      %c0_24 = arith.constant 0 : index
      %c0_25 = arith.constant 0 : index
      %38 = vector.load %arg8[%c0_24, %c0_25] : memref<8x128xf32, #tpu.memory_space<vmem>>, vector<8x128xf32>
      tpu.vector_store %arg8[%c0_24, %c0_25], %37 {strides = array<i32>} : memref<8x128xf32, #tpu.memory_space<vmem>>, vector<8x128xf32>,
    } else {
    }
    %true = arith.constant true
    %11 = arith.xori %8, %true : i1
    %12 = arith.extui %11 : i1 to i32
    %c0_i32_5 = arith.constant 0 : i32
    %13 = arith.cmpi ne, %12, %c0_i32_5 : i32
    scf.if %13 {
      %c0_8 = arith.constant 0 : index
      %c0_9 = arith.constant 0 : index
      %17 = vector.load %arg4[%c0_8, %c0_9] : memref<16x128xf32, #tpu.memory_space<vmem>>, vector<16x128xf32>
      %c0_10 = arith.constant 0 : index
      %c0_11 = arith.constant 0 : index
      %18 = vector.load %arg3[%c0_10, %c0_11] : memref<16x128xf32, #tpu.memory_space<vmem>>, vector<16x128xf32>
      %19 = vector.broadcast %3 : f32 to vector<16x128xf32>
      %20 = arith.subf %17, %19 : vector<16x128xf32>
      %21 = arith.subf %17, %18 : vector<16x128xf32>
      %c0_i32_12 = arith.constant 0 : i32
      %22 = arith.addi %6, %c0_i32_12 : i32
      %23 = tpu.iota {dimensions = array<i32: 0>} : vector<16x128xi32>
      %24 = vector.broadcast %22 : i32 to vector<16x128xi32>
      %25 = arith.addi %24, %23 : vector<16x128xi32>
      %c16_i32_13 = arith.constant 16 : i32
      %26 = vector.broadcast %c16_i32_13 : i32 to vector<16x128xi32>
      %27 = arith.cmpi slt, %25, %26 : vector<16x128xi32>
      %cst = arith.constant 0.000000e+00 : f32
      %28 = vector.broadcast %cst : f32 to vector<16x128xf32>
      %29 = arith.select %27, %20, %28 : vector<16x128xi1>, vector<16x128xf32>
      %cst_14 = arith.constant 0.000000e+00 : f32
      %30 = vector.broadcast %cst_14 : f32 to vector<16x128xf32>
      %31 = arith.select %27, %21, %30 : vector<16x128xi1>, vector<16x128xf32>
      %c0_15 = arith.constant 0 : index
      %c0_16 = arith.constant 0 : index
      %32 = vector.load %arg6[%c0_15, %c0_16] : memref<8x128xf32, #tpu.memory_space<vmem>>, vector<8x128xf32>
      %33 = vector.shape_cast %29 : vector<16x128xf32> to vector<2x8x128xf32>
      %cst_17 = arith.constant dense<0.000000e+00> : vector<8x128xf32>
      %34 = vector.multi_reduction <add>, %33, %cst_17 [0] : vector<2x8x128xf32> to vector<8x128xf32>
      %35 = arith.addf %32, %34 : vector<8x128xf32>
      %c0_18 = arith.constant 0 : index
      %c0_19 = arith.constant 0 : index
      %36 = vector.load %arg6[%c0_18, %c0_19] : memref<8x128xf32, #tpu.memory_space<vmem>>, vector<8x128xf32>
      tpu.vector_store %arg6[%c0_18, %c0_19], %35 {strides = array<i32>} : memref<8x128xf32, #tpu.memory_space<vmem>>, vector<8x128xf32>,
      %c0_20 = arith.constant 0 : index
      %c0_21 = arith.constant 0 : index
      %37 = vector.load %arg7[%c0_20, %c0_21] : memref<8x128xf32, #tpu.memory_space<vmem>>, vector<8x128xf32>
      %38 = arith.mulf %29, %29 : vector<16x128xf32>
      %39 = vector.shape_cast %38 : vector<16x128xf32> to vector<2x8x128xf32>
      %cst_22 = arith.constant dense<0.000000e+00> : vector<8x128xf32>
      %40 = vector.multi_reduction <add>, %39, %cst_22 [0] : vector<2x8x128xf32> to vector<8x128xf32>
      %41 = arith.addf %37, %40 : vector<8x128xf32>
      %c0_23 = arith.constant 0 : index
      %c0_24 = arith.constant 0 : index
      %42 = vector.load %arg7[%c0_23, %c0_24] : memref<8x128xf32, #tpu.memory_space<vmem>>, vector<8x128xf32>
      tpu.vector_store %arg7[%c0_23, %c0_24], %41 {strides = array<i32>} : memref<8x128xf32, #tpu.memory_space<vmem>>, vector<8x128xf32>,
      %c0_25 = arith.constant 0 : index
      %c0_26 = arith.constant 0 : index
      %43 = vector.load %arg8[%c0_25, %c0_26] : memref<8x128xf32, #tpu.memory_space<vmem>>, vector<8x128xf32>
      %44 = arith.mulf %31, %31 : vector<16x128xf32>
      %45 = vector.shape_cast %44 : vector<16x128xf32> to vector<2x8x128xf32>
      %cst_27 = arith.constant dense<0.000000e+00> : vector<8x128xf32>
      %46 = vector.multi_reduction <add>, %45, %cst_27 [0] : vector<2x8x128xf32> to vector<8x128xf32>
      %47 = arith.addf %43, %46 : vector<8x128xf32>
      %c0_28 = arith.constant 0 : index
      %c0_29 = arith.constant 0 : index
      %48 = vector.load %arg8[%c0_28, %c0_29] : memref<8x128xf32, #tpu.memory_space<vmem>>, vector<8x128xf32>
      tpu.vector_store %arg8[%c0_28, %c0_29], %47 {strides = array<i32>} : memref<8x128xf32, #tpu.memory_space<vmem>>, vector<8x128xf32>,
    } else {
    }
    %c0_i32_6 = arith.constant 0 : i32
    %14 = arith.cmpi eq, %arg1, %c0_i32_6 : i32
    %15 = arith.extui %14 : i1 to i32
    %c0_i32_7 = arith.constant 0 : i32
    %16 = arith.cmpi ne, %15, %c0_i32_7 : i32
    scf.if %16 {
      %c0_8 = arith.constant 0 : index
      %c0_9 = arith.constant 0 : index
      %17 = vector.load %arg6[%c0_8, %c0_9] : memref<8x128xf32, #tpu.memory_space<vmem>>, vector<8x128xf32>
      %c0_10 = arith.constant 0 : index
      %c0_11 = arith.constant 0 : index
      %c0_12 = arith.constant 0 : index
      %c0_13 = arith.constant 0 : index
      %18 = vector.load %arg5[%c0_10, %c0_11, %c0_12, %c0_13] : memref<1x3x8x128xf32, #tpu.memory_space<vmem>>, vector<1x1x8x128xf32>
      %19 = vector.shape_cast %18 : vector<1x1x8x128xf32> to vector<8x128xf32>
      %20 = vector.shape_cast %17 : vector<8x128xf32> to vector<1x1x8x128xf32>
      tpu.vector_store %arg5[%c0_10, %c0_11, %c0_12, %c0_13], %20 {strides = array<i32>} : memref<1x3x8x128xf32, #tpu.memory_space<vmem>>, vector<1x1x8x128xf32>,
      %c0_14 = arith.constant 0 : index
      %c0_15 = arith.constant 0 : index
      %21 = vector.load %arg7[%c0_14, %c0_15] : memref<8x128xf32, #tpu.memory_space<vmem>>, vector<8x128xf32>
      %c0_16 = arith.constant 0 : index
      %c1 = arith.constant 1 : index
      %c0_17 = arith.constant 0 : index
      %c0_18 = arith.constant 0 : index
      %22 = vector.load %arg5[%c0_16, %c1, %c0_17, %c0_18] : memref<1x3x8x128xf32, #tpu.memory_space<vmem>>, vector<1x1x8x128xf32>
      %23 = vector.shape_cast %22 : vector<1x1x8x128xf32> to vector<8x128xf32>
      %24 = vector.shape_cast %21 : vector<8x128xf32> to vector<1x1x8x128xf32>
      tpu.vector_store %arg5[%c0_16, %c1, %c0_17, %c0_18], %24 {strides = array<i32>} : memref<1x3x8x128xf32, #tpu.memory_space<vmem>>, vector<1x1x8x128xf32>,
      %c0_19 = arith.constant 0 : index
      %c0_20 = arith.constant 0 : index
      %25 = vector.load %arg8[%c0_19, %c0_20] : memref<8x128xf32, #tpu.memory_space<vmem>>, vector<8x128xf32>
      %c0_21 = arith.constant 0 : index
      %c2 = arith.constant 2 : index
      %c0_22 = arith.constant 0 : index
      %c0_23 = arith.constant 0 : index
      %26 = vector.load %arg5[%c0_21, %c2, %c0_22, %c0_23] : memref<1x3x8x128xf32, #tpu.memory_space<vmem>>, vector<1x1x8x128xf32>
      %27 = vector.shape_cast %26 : vector<1x1x8x128xf32> to vector<8x128xf32>
      %28 = vector.shape_cast %25 : vector<8x128xf32> to vector<1x1x8x128xf32>
      tpu.vector_store %arg5[%c0_21, %c2, %c0_22, %c0_23], %28 {strides = array<i32>} : memref<1x3x8x128xf32, #tpu.memory_space<vmem>>, vector<1x1x8x128xf32>,
    } else {
    }
    return
  }
  func.func @transform_0(%arg0: i32, %arg1: i32) -> (i32, i32) {
    %c0_i32 = arith.constant 0 : i32
    %c0_i32_0 = arith.constant 0 : i32
    %c0_i32_1 = arith.constant 0 : i32
    return %c0_i32, %c0_i32_0 : i32, i32
  }
  func.func @transform_1(%arg0: i32, %arg1: i32) -> (i32, i32) {
    %c1_i32 = arith.constant 1 : i32
    %0 = arith.muli %arg0, %c1_i32 : i32
    %1 = arith.addi %0, %arg1 : i32
    %c0_i32 = arith.constant 0 : i32
    %2 = arith.minsi %1, %c0_i32 : i32
    %c0_i32_0 = arith.constant 0 : i32
    %c0_i32_1 = arith.constant 0 : i32
    return %2, %c0_i32_0 : i32, i32
  }
  func.func @transform_2(%arg0: i32, %arg1: i32) -> (i32, i32) {
    %c1_i32 = arith.constant 1 : i32
    %0 = arith.muli %arg0, %c1_i32 : i32
    %1 = arith.addi %0, %arg1 : i32
    %c0_i32 = arith.constant 0 : i32
    %2 = arith.minsi %1, %c0_i32 : i32
    %c0_i32_0 = arith.constant 0 : i32
    %c0_i32_1 = arith.constant 0 : i32
    return %2, %c0_i32_0 : i32, i32
  }
  func.func @transform_3(%arg0: i32, %arg1: i32) -> (i32, i32, i32, i32) {
    %c0_i32 = arith.constant 0 : i32
    %c0_i32_0 = arith.constant 0 : i32
    %c0_i32_1 = arith.constant 0 : i32
    %c0_i32_2 = arith.constant 0 : i32
    return %arg0, %c0_i32, %c0_i32_0, %c0_i32_1 : i32, i32, i32, i32
  }
}

</mosaic_0001>

<bundles_post_ra>
// kernel: tpu_custom_call.1
= control target key start
LH: loop header
LB: loop body
LE: loop exit
PB: predicated region body
PF: predicated region fallthrough
CT: control target
= control target key end

     0   :  { %9 = vsyncpa [#allocation7], 0  ;;  %s328_s0 = inlined_call_operand.<no memory space> [shape: f32[1,1], index: 0, kind: input, shape index: {}]   ;;  %s329_s1 = inlined_call_operand.hbm [shape: f32[16,128], index: 1, kind: input, shape index: {}]   ;;  %s330_s2 = inlined_call_operand.hbm [shape: f32[16,128], index: 2, kind: input, shape index: {}]   ;;  %s331_s3 = inlined_call_operand.hbm [shape: f32[1,3,8,128], index: 3, kind: output, shape index: {}]  }
   0x1   :  { %10 = vsyncpa [#allocation10], 0 }
   0x2   :  { %11 = vsyncpa [#allocation8], 0  ;;  %s255_s12 = smov [#allocation6]   ;;  %s183_s16 = scalar_lea.hbm %s329_s1, 256 }
   0x3   :  { %s25_s13 = sshll.u32 %s255_s12, 4  ;;  %p184_p0 = scmp.ne.s32.totalorder %s329_s1, %s183_s16  ;;  %s26_s13 = int_to_ptr.vmem [resolvable:$true] %s25_s13 }
   0x4   :  { %p187_p1 = scmp.lt.u32.totalorder %s183_s16, %s329_s1 }
   0x6   :  { %p189_p2 = pnand %p187_p1, %p184_p0 }
   0x8   :  { %192 = shalt.err (!%p189_p2)
}
   0x9   :  { %s193_s21 = scalar_lea.vmem %s26_s13, 256  ;;  %p198_p4 = scmp.lt.s32.totalorder %s26_s13, %s26_s13 }
   0xa   :  { %p194_p3 = scmp.ne.s32.totalorder %s26_s13, %s193_s21  ;;  %p199_p5 = scmp.lt.s32.totalorder %s193_s21, %s193_s21 }
   0xc   :  { %p200_p6 = por %p199_p5, %p198_p4 }
   0xe   :  { %p201_p7 = pnand %p200_p6, %p194_p3 }
  0x10   :  { %204 = shalt.err (!%p201_p7)
}
  0x11   :  { %s256_s22 = smov 128   ;;  %s257_s23 = smov 8  }
  0x12   :  { %31 = dma.hbm_to_vmem [thread:$0]  %s329_s1, 256, %s26_s13, [#allocation7], %s256_s22, %s256_s22, %s257_s23  }
  0x13   :  { %s258_s26 = smov [#allocation9]   ;;  %s205_s30 = scalar_lea.hbm %s330_s2, 256 }
  0x14   :  { %s43_s27 = sshll.u32 %s258_s26, 4  ;;  %p206_p8 = scmp.ne.s32.totalorder %s330_s2, %s205_s30  ;;  %s44_s27 = int_to_ptr.vmem [resolvable:$true] %s43_s27 }
  0x15   :  { %p209_p9 = scmp.lt.u32.totalorder %s205_s30, %s330_s2 }
  0x17   :  { %p211_p10 = pnand %p209_p9, %p206_p8 }
  0x19   :  { %214 = shalt.err (!%p211_p10)
}
  0x1a   :  { %s215_s8 = scalar_lea.vmem %s44_s27, 256  ;;  %p220_p12 = scmp.lt.s32.totalorder %s44_s27, %s44_s27 }
  0x1b   :  { %p216_p11 = scmp.ne.s32.totalorder %s44_s27, %s215_s8  ;;  %p221_p13 = scmp.lt.s32.totalorder %s215_s8, %s215_s8 }
  0x1d   :  { %p222_p0 = por %p221_p13, %p220_p12 }
  0x1f   :  { %p223_p1 = pnand %p222_p0, %p216_p11 }
  0x21   :  { %226 = shalt.err (!%p223_p1)
}
  0x22   :  { %49 = dma.hbm_to_vmem [thread:$0]  %s330_s2, 256, %s44_s27, [#allocation10], %s256_s22, %s256_s22, %s257_s23  }
  0x23   :  { %249 = dma.done.wait [#allocation7], 256  }
  0x24   :  { %250 = vsyncadd [#allocation7], 4294967040 }
  0x25   :  { %251 = dma.done.wait [#allocation10], 256  }
  0x26   :  { %252 = vsyncadd [#allocation10], 4294967040  ;;  %v83_v0 = vstv %s328_s0  ;;  %v79_v1 = vld [vmem:[#allocation9] sm:$0xff]  ;;  %v80_v2 = vld [vmem:[#allocation9 + $0x8] sm:$0xff]  ;;  %s259_s2 = smov [#allocation11]  }
  0x27   :  { %v81_v3 = vld [vmem:[#allocation6] sm:$0xff]  ;;  %v84_v4 = vsub.f32 %v79_v1, %v83_v0  ;;  %v85_v5 = vsub.f32 %v80_v2, %v83_v0  ;;  %v82_v6 = vld [vmem:[#allocation6 + $0x8] sm:$0xff]  ;;  %s161_s12 = sshll.u32 %s259_s2, 4  ;;  %s162_s12 = int_to_ptr.vmem [resolvable:$true] %s161_s12 }
  0x28   :  { %v86_v7 = vsub.f32 %v79_v1, %v81_v3  ;;  %v87_v8 = vsub.f32 %v80_v2, %v82_v6  ;;  %s227_s0 = scalar_lea.vmem %s162_s12, 384  ;;  %p232_p3 = scmp.lt.s32.totalorder %s162_s12, %s162_s12 }
  0x29   :  { %v89_v9 = vadd.f32 %v85_v5, %v84_v4  ;;  %v93_v10 = vmul.f32 %v84_v4, %v84_v4  ;;  %v94_v11 = vmul.f32 %v85_v5, %v85_v5  ;;  %p228_p2 = scmp.ne.s32.totalorder %s162_s12, %s227_s0  ;;  %p233_p4 = scmp.lt.s32.totalorder %s227_s0, %s227_s0 }
  0x2a   :  { %v99_v12 = vmul.f32 %v86_v7, %v86_v7  ;;  %v100_v13 = vmul.f32 %v87_v8, %v87_v8 }
  0x2b   :  { %149 = vst [vmem:[#allocation11] sm:$0xff] %v89_v9  ;;  %v95_v14 = vadd.f32 %v94_v11, %v93_v10  ;;  %p234_p5 = por %p233_p4, %p232_p3 }
  0x2c   :  { %v101_v15 = vadd.f32 %v100_v13, %v99_v12 }
  0x2d   :  { %152 = vst [vmem:[#allocation11 + $0x8] sm:$0xff] %v95_v14  ;;  %p235_p6 = pnand %p234_p5, %p228_p2 }
  0x2e   :  { %155 = vst [vmem:[#allocation11 + $0x10] sm:$0xff] %v101_v15 }
  0x2f   :  { %238 = shalt.err (!%p235_p6)
}
  0x30   :  { %s239_s15 = scalar_lea.hbm %s331_s3, 384 }
  0x31   :  { %p240_p7 = scmp.ne.s32.totalorder %s331_s3, %s239_s15  ;;  %p243_p8 = scmp.lt.u32.totalorder %s239_s15, %s331_s3 }
  0x33   :  { %p245_p9 = pnand %p243_p8, %p240_p7 }
  0x35   :  { %248 = shalt.err (!%p245_p9)
}
  0x36   :  { %167 = dma.vmem_to_hbm [thread:$0]  %s162_s12, 384, %s331_s3, [#allocation8], %s256_s22, %s256_s22, %s257_s23  }
  0x37   :  { %253 = dma.done.wait [#allocation8], 384  }
  0x38   :  { %254 = vsyncadd [#allocation8], 4294966912 }
  0x39   :  { %171 = vsyncpa [#allocation7], 1 }
  0x3a   :  { %172 = vsyncpa [#allocation10], 1 }
  0x3b   :  { %173 = vsyncpa [#allocation8], 1 }

</bundles_post_ra>
